<compile_context>
chip_gen: v5e
topology: v5e:2x2
jax: 0.10.0
libtpu: 0.0.40
codegen_flags: <defaults>
</compile_context>

<pallas_src>
import functools

import jax
import jax.numpy as jnp
from jax.experimental import pallas as pl
from jax.experimental.pallas import tpu as pltpu


# ----------------------------------------------------------------------------
# Kernel
# ----------------------------------------------------------------------------
def _simam_kernel(x_ref, o_ref, *, inv_n, e_lambda, reduce_axis, elem_dtype):
    # x_ref / o_ref: (tile_rows, H*W) in row layout, (H*W, tile_bc) in column
    # layout.  The reduced axis (H*W) is never tiled, so partial blocks along
    # the channel axis stay per-channel independent.

    # Pass 1: per-channel statistics, accumulated in f32 regardless of storage
    # dtype (matches the f32 reference; v5e has no bf16 VPU anyway).
    x32 = x_ref[...].astype(jnp.float32)
    mu = jnp.mean(x32, axis=reduce_axis, keepdims=True)
    d = x32 - mu
    s = jnp.sum(d * d, axis=reduce_axis, keepdims=True)
    # Hoist the per-channel denominator: one tiny reciprocal + broadcast
    # multiply instead of a full-tile divide.
    inv_den = pl.reciprocal(4.0 * (s * inv_n + e_lambda), approx=False)

    # Pass 2: bulk elementwise pass.  Recompute (x - mu)^2 from x_ref rather
    # than keeping a full-tile temporary live across the reduction (less vreg
    # and vld/vst pressure).  Runs in bf16 when requested (v6e/v7x, bf16 data).
    xe = x_ref[...].astype(elem_dtype)
    de = xe - mu.astype(elem_dtype)
    y = (de * de) * inv_den.astype(elem_dtype) + 0.5
    # sigmoid(y) via the tanh identity: a single EUP op per element.
    sig = 0.5 * (1.0 + jnp.tanh(0.5 * y))
    o_ref[...] = (xe * sig).astype(o_ref.dtype)


# ----------------------------------------------------------------------------
# Tiling / hardware helpers
# ----------------------------------------------------------------------------
def _cdiv(a, b):
    return -(-a // b)


def _round_up(x, m):
    return ((x + m - 1) // m) * m


def _device_kind():
    try:
        return jax.devices()[0].device_kind.lower()
    except Exception:
        return ""


def _vmem_limit_bytes():
    # Generation-aware scoped-VMEM limit (~half of physical VMEM so the
    # double-buffered in/out blocks plus f32 temporaries fit):
    #   v5e / v6e: 128 MiB physical -> 64 MiB scoped
    #   v7x      :  64 MiB physical -> 32 MiB scoped
    cap = None
    try:
        cap = getattr(pltpu.get_tpu_info(), "vmem_capacity_bytes", None)
    except Exception:
        cap = None
    if not cap:
        cap = (64 if "v7" in _device_kind() else 128) * 1024 * 1024
    return int(min(cap // 2, 64 * 1024 * 1024))


def _num_tensorcores():
    # v7x has 2 TensorCores per chip; v5e/v6e have 1.  Perf-only decision.
    return 2 if "v7" in _device_kind() else 1


def _has_bf16_vpu():
    # v5e (and older) VPU/EUP have no bf16 path; keep f32 elementwise there.
    kind = _device_kind()
    return not any(v in kind for v in ("v2", "v3", "v4", "v5"))


def _sublane_multiple(dtype):
    # f32 -> 8 rows per vreg, bf16 -> 16, int8/fp8 -> 32 (packed sublanes).
    itemsize = jnp.dtype(dtype).itemsize
    return max(8, 32 // max(1, itemsize))


def _pick_tile(n_tiled, other_extent, dtype, align, vmem_limit, num_tc):
    """Tile size along the tiled channel axis (B*C); the H*W axis stays whole."""
    if n_tiled <= align:
        return n_tiled

    store_bytes = jnp.dtype(dtype).itemsize
    # ~4 MiB of storage-dtype data per block amortizes the ~0.35 us/grid-step
    # pipeline overhead (measured streaming kernels reach >=85% of roofline).
    target = (4 * 1024 * 1024) // max(1, other_extent * store_bytes)
    # VMEM ceiling: double-buffered in+out blocks (storage dtype) plus roughly
    # two live f32 temporaries inside the kernel, with ~40% headroom.
    per_elem = 4 * store_bytes + 2 * 4
    vmem_cap = int(0.6 * vmem_limit) // max(1, other_extent * per_elem)

    rows = max(align, (min(target, vmem_cap) // align) * align)
    rows = min(rows, n_tiled)

    if num_tc >= 2 and n_tiled > align:
        # Shape the grid to an even number of (near-)equal steps so both
        # TensorCores stay busy; skip on single-TC chips (pure step overhead).
        steps = _round_up(max(2, _cdiv(n_tiled, rows)), 2)
        cand = rows
        for _ in range(4):
            cand = min(n_tiled, max(align, _round_up(_cdiv(n_tiled, steps), align)))
            if _cdiv(n_tiled, cand) % 2 == 0:
                break
            steps += 2
        rows = cand
    return rows


# ----------------------------------------------------------------------------
# Wrapper
# ----------------------------------------------------------------------------
def simam_pallas(x, e_lambda=1e-4):
    """SimAM forward.  x: (B, C, H, W) float array.  Returns same shape/dtype."""
    b, c, h, w = x.shape
    bc, hw = b * c, h * w
    n = float(hw - 1)
    # Degenerate hw == 1 keeps the reference's divide-by-zero NaN semantics.
    inv_n = (1.0 / n) if n > 0.0 else float("inf")

    vmem_limit = _vmem_limit_bytes()
    num_tc = _num_tensorcores()
    elem_dtype = (jnp.bfloat16
                  if (x.dtype == jnp.bfloat16 and _has_bf16_vpu())
                  else jnp.float32)

    # Lane-dense layout selection (see module docstring).
    use_col = (hw < 128) and (bc >= 128)

    kernel = functools.partial(
        _simam_kernel,
        inv_n=inv_n,
        e_lambda=float(e_lambda),
        reduce_axis=0 if use_col else 1,
        elem_dtype=elem_dtype,
    )
    params = pltpu.CompilerParams(
        dimension_semantics=("parallel",),
        vmem_limit_bytes=vmem_limit,
    )

    if use_col:
        # Column layout: (H*W, B*C); channels on the lane axis, reduction over
        # sublanes.  The wrapper transposes are layout plumbing only.
        xf = x.reshape(bc, hw).T
        tile_bc = _pick_tile(bc, hw, x.dtype, 128, vmem_limit, num_tc)
        grid = (pl.cdiv(bc, tile_bc),)
        out = pl.pallas_call(
            kernel,
            out_shape=jax.ShapeDtypeStruct((hw, bc), x.dtype),
            grid=grid,
            in_specs=[pl.BlockSpec((hw, tile_bc), lambda i: (0, i))],
            out_specs=pl.BlockSpec((hw, tile_bc), lambda i: (0, i)),
            compiler_params=params,
        )(xf)
        return out.T.reshape(b, c, h, w)

    # Row layout: (B*C, H*W); one row per channel, reduction over lanes.
    xf = x.reshape(bc, hw)
    sub = _sublane_multiple(x.dtype)
    tile_rows = _pick_tile(bc, hw, x.dtype, sub, vmem_limit, num_tc)
    grid = (pl.cdiv(bc, tile_rows),)
    out = pl.pallas_call(
        kernel,
        out_shape=jax.ShapeDtypeStruct((bc, hw), x.dtype),
        grid=grid,
        in_specs=[pl.BlockSpec((tile_rows, hw), lambda i: (i, 0))],
        out_specs=pl.BlockSpec((tile_rows, hw), lambda i: (i, 0)),
        compiler_params=params,
    )(xf)
    return out.reshape(b, c, h, w)


# ----------------------------------------------------------------------------
# Pure-JAX reference (mirrors the PyTorch forward exactly)
# ----------------------------------------------------------------------------
def simam_reference(x, e_lambda=1e-4):
    b, c, h, w = x.shape
    n = w * h - 1
    x_minus_mu_square = (x - x.mean(axis=(2, 3), keepdims=True)) ** 2
    y = x_minus_mu_square / (
        4.0 * (x_minus_mu_square.sum(axis=(2, 3), keepdims=True) / n + e_lambda)
    ) + 0.5
    return x * jax.nn.sigmoid(y)


if __name__ == "__main__":
    key = jax.random.PRNGKey(0)
    k1, k2, k3, k4 = jax.random.split(key, 4)

    # 1) Primary test: module-sized input (B=2, C=4, 16x16 spatial), row layout.
    x = jax.random.normal(k1, (2, 4, 16, 16), dtype=jnp.float32)
    out = jax.block_until_ready(simam_pallas(x, e_lambda=1e-4))
    ref = simam_reference(x, e_lambda=1e-4)
    assert out.shape == x.shape and out.dtype == x.dtype
    assert jnp.allclose(out, ref, atol=1e-5, rtol=1e-5), "mismatch (row layout)"

    # 2) B*C not a multiple of the tile: partial last block / balanced split.
    x2 = jax.random.normal(k2, (2, 10, 16, 16), dtype=jnp.float32)
    out2 = jax.block_until_ready(simam_pallas(x2, e_lambda=1e-4))
    ref2 = simam_reference(x2, e_lambda=1e-4)
    assert jnp.allclose(out2, ref2, atol=1e-5, rtol=1e-5), "mismatch (partial block)"

    # 3) Small spatial map (7x7 = 49 < 128) with bc >= 128: lane-dense column
    #    layout (channels on the lane axis, reduction over sublanes).
    x3 = jax.random.normal(k3, (2, 64, 7, 7), dtype=jnp.float32)
    out3 = jax.block_until_ready(simam_pallas(x3, e_lambda=1e-4))
    ref3 = simam_reference(x3, e_lambda=1e-4)
    assert jnp.allclose(out3, ref3, atol=1e-5, rtol=1e-5), "mismatch (column layout)"

    # 4) bf16 storage: reductions stay f32, elementwise pass may run in bf16 on
    #    bf16-capable chips.  Compare against an f32 reference, loose tolerance.
    x4 = jax.random.normal(k4, (2, 8, 16, 16), dtype=jnp.bfloat16)
    out4 = jax.block_until_ready(simam_pallas(x4, e_lambda=1e-4))
    ref4 = simam_reference(x4.astype(jnp.float32), e_lambda=1e-4)
    assert out4.dtype == jnp.bfloat16
    assert jnp.allclose(out4.astype(jnp.float32), ref4, atol=5e-2, rtol=5e-2), \
        "mismatch (bf16)"

    print("KERNEL_OK")
</pallas_src>

<mosaic_0001>
module attributes {stable_mosaic.version = 11 : i64} {
  func.func @_simam_kernel(%arg0: i32, %arg1: memref<8x256xf32, #tpu.memory_space<vmem>>, %arg2: memref<8x256xf32, #tpu.memory_space<vmem>>) attributes {dimension_semantics = [#tpu.dimension_semantics<parallel>], iteration_bounds = array<i64: 1>, scalar_prefetch = 0 : i64, scratch_operands = 0 : i64, tpu.core_type = #tpu.core_type<tc>, window_params = [{transform_indices = @transform_0, window_bounds = array<i64: 8, 256>}, {transform_indices = @transform_1, window_bounds = array<i64: 8, 256>}]} {
    %c0 = arith.constant 0 : index
    %c0_0 = arith.constant 0 : index
    %0 = vector.load %arg1[%c0, %c0_0] : memref<8x256xf32, #tpu.memory_space<vmem>>, vector<8x256xf32>
    %cst = arith.constant dense<0.000000e+00> : vector<8xf32>
    %1 = vector.multi_reduction <add>, %0, %cst [1] : vector<8x256xf32> to vector<8xf32>
    %2 = vector.shape_cast %1 : vector<8xf32> to vector<8x1xf32>
    %cst_1 = arith.constant 2.560000e+02 : f32
    %3 = vector.broadcast %cst_1 : f32 to vector<8x1xf32>
    %4 = arith.divf %2, %3 : vector<8x1xf32>
    %5 = vector.broadcast %4 : vector<8x1xf32> to vector<8x256xf32>
    %6 = arith.subf %0, %5 : vector<8x256xf32>
    %7 = arith.mulf %6, %6 : vector<8x256xf32>
    %cst_2 = arith.constant dense<0.000000e+00> : vector<8xf32>
    %8 = vector.multi_reduction <add>, %7, %cst_2 [1] : vector<8x256xf32> to vector<8xf32>
    %9 = vector.shape_cast %8 : vector<8xf32> to vector<8x1xf32>
    %cst_3 = arith.constant 0.00392156886 : f32
    %10 = vector.broadcast %cst_3 : f32 to vector<8x1xf32>
    %11 = arith.mulf %9, %10 : vector<8x1xf32>
    %cst_4 = arith.constant 9.99999974E-5 : f32
    %12 = vector.broadcast %cst_4 : f32 to vector<8x1xf32>
    %13 = arith.addf %11, %12 : vector<8x1xf32>
    %cst_5 = arith.constant 4.000000e+00 : f32
    %14 = vector.broadcast %cst_5 : f32 to vector<8x1xf32>
    %15 = arith.mulf %14, %13 : vector<8x1xf32>
    %16 = tpu.reciprocal %15 : vector<8x1xf32> -> vector<8x1xf32>
    %c0_6 = arith.constant 0 : index
    %c0_7 = arith.constant 0 : index
    %17 = vector.load %arg1[%c0_6, %c0_7] : memref<8x256xf32, #tpu.memory_space<vmem>>, vector<8x256xf32>
    %18 = vector.broadcast %4 : vector<8x1xf32> to vector<8x256xf32>
    %19 = arith.subf %17, %18 : vector<8x256xf32>
    %20 = arith.mulf %19, %19 : vector<8x256xf32>
    %21 = vector.broadcast %16 : vector<8x1xf32> to vector<8x256xf32>
    %22 = arith.mulf %20, %21 : vector<8x256xf32>
    %cst_8 = arith.constant 5.000000e-01 : f32
    %23 = vector.broadcast %cst_8 : f32 to vector<8x256xf32>
    %24 = arith.addf %22, %23 : vector<8x256xf32>
    %cst_9 = arith.constant 5.000000e-01 : f32
    %25 = vector.broadcast %cst_9 : f32 to vector<8x256xf32>
    %26 = arith.mulf %25, %24 : vector<8x256xf32>
    %27 = math.tanh %26 : vector<8x256xf32>
    %cst_10 = arith.constant 1.000000e+00 : f32
    %28 = vector.broadcast %cst_10 : f32 to vector<8x256xf32>
    %29 = arith.addf %28, %27 : vector<8x256xf32>
    %cst_11 = arith.constant 5.000000e-01 : f32
    %30 = vector.broadcast %cst_11 : f32 to vector<8x256xf32>
    %31 = arith.mulf %30, %29 : vector<8x256xf32>
    %32 = arith.mulf %17, %31 : vector<8x256xf32>
    %c0_12 = arith.constant 0 : index
    %c0_13 = arith.constant 0 : index
    %33 = vector.load %arg2[%c0_12, %c0_13] : memref<8x256xf32, #tpu.memory_space<vmem>>, vector<8x256xf32>
    tpu.vector_store %arg2[%c0_12, %c0_13], %32 {strides = array<i32>} : memref<8x256xf32, #tpu.memory_space<vmem>>, vector<8x256xf32>,
    return
  }
  func.func @transform_0(%arg0: i32) -> (i32, i32) {
    %c0_i32 = arith.constant 0 : i32
    %c0_i32_0 = arith.constant 0 : i32
    return %arg0, %c0_i32 : i32, i32
  }
  func.func @transform_1(%arg0: i32) -> (i32, i32) {
    %c0_i32 = arith.constant 0 : i32
    %c0_i32_0 = arith.constant 0 : i32
    return %arg0, %c0_i32 : i32, i32
  }
}

</mosaic_0001>

<bundles_post_ra>
// kernel: tpu_custom_call.1
= control target key start
LH: loop header
LB: loop body
LE: loop exit
PB: predicated region body
PF: predicated region fallthrough
CT: control target
= control target key end

     0   :  { %6 = vsyncpa [#allocation3], 0  ;;  %s175_s0 = inlined_call_operand.hbm [shape: f32[8,256], index: 0, kind: input, shape index: {}]   ;;  %s176_s1 = inlined_call_operand.hbm [shape: f32[8,256], index: 1, kind: output, shape index: {}]  }
   0x1   :  { %7 = vsyncpa [#allocation4], 0  ;;  %s13_s8 = sshll.u32 %s175_s0, 4  ;;  %s156_s9 = smov [#allocation2]   ;;  %s14_s8 = int_to_ptr.hbm [resolvable:$true] %s13_s8 }
   0x2   :  { %s15_s10 = sshll.u32 %s156_s9, 4  ;;  %s16_s10 = int_to_ptr.vmem [resolvable:$true] %s15_s10 }
   0x3   :  { %18 = dma.hbm_to_vmem [thread:$0]  %s14_s8, 256, %s16_s10, [#allocation3]  }
   0x4   :  { %152 = dma.done.wait [#allocation3], 256  }
   0x5   :  { %153 = vsyncadd [#allocation3], 4294967040  ;;  %v23_v0 = vld [vmem:[#allocation2] sm:$0xff]  ;;  %v24_v1 = vld [vmem:[#allocation2 + $0x8] sm:$0xff]  ;;  %v157_v3 = vmov 256.0   ;;  %s158_s0 = smov [#allocation5]  }
   0x6   :  { %v25_v2 = vadd.f32 %v24_v1, %v23_v0  ;;  %96 = vrcp.f32 %v157_v3  ;;  %s81_s11 = sshll.u32 %s158_s0, 4  ;;  %s83_s14 = sshll.u32 %s176_s1, 4  ;;  %s82_s11 = int_to_ptr.vmem [resolvable:$true] %s81_s11  ;;  %s84_s14 = int_to_ptr.hbm [resolvable:$true] %s83_s14 }
   0x8   :  { %26 = vadd.xlane.f32.xlu0 %v25_v2 }
   0xc   :  { %v97_v4 = vpop.eup %96 }
   0xd   :  { %v29_v5 = vmul.f32 256.0, %v97_v4  ;;  %vm33_vm0 = vweird.f32 %v97_v4 }
   0xf   :  { %v30_v6 = vsub.f32 1.0, %v29_v5 }
  0x11   :  { %v31_v7 = vmul.f32 %v97_v4, %v30_v6 }
  0x13   :  { %v32_v8 = vadd.f32 %v97_v4, %v31_v7 }
  0x15   :  { %v34_v9 = vsel %vm33_vm0, %v97_v4, %v32_v8 }
  0x7b   :  { %v27_v10 = vpop.xlane.xlu0 %26 }
  0x7c   :  { %v35_v11 = vmul.f32 %v34_v9, %v27_v10 }
  0x7e   :  { %v36_v12 = vsub.f32 %v23_v0, %v35_v11  ;;  %v37_v13 = vsub.f32 %v24_v1, %v35_v11 }
  0x80   :  { %v38_v14 = vmul.f32 %v36_v12, %v36_v12  ;;  %v39_v15 = vmul.f32 %v37_v13, %v37_v13 }
  0x82   :  { %v40_v16 = vadd.f32 %v39_v15, %v38_v14 }
  0x84   :  { %41 = vadd.xlane.f32.xlu0 %v40_v16 }
  0xf7   :  { %v42_v17 = vpop.xlane.xlu0 %41 }
  0xf8   :  { %v43_v18 = vmul.f32 0.003921569, %v42_v17 }
  0xfa   :  { %v44_v19 = vadd.f32 0.0001, %v43_v18 }
  0xfc   :  { %v45_v20 = vmul.f32 4.0, %v44_v19 }
  0xfe   :  { %98 = vrcp.f32 %v45_v20  ;;  %v57_v24 = vand.u32 2147483648, %v45_v20  ;;  %v55_v26 = vand.u32 2147483647, %v45_v20  ;;  %vm51_vm2 = vweird.f32 %v45_v20 }
 0x100   :  { %v58_v28 = vor.u32 1.1754944e-38, %v57_v24  ;;  %vm56_vm4 = vcmp.eq.f32.partialorder %v55_v26, 8.507059e+37 }
 0x104   :  { %v99_v21 = vpop.eup %98 }
 0x105   :  { %v47_v22 = vmul.f32 %v99_v21, %v45_v20  ;;  %vm52_vm1 = vweird.f32 %v99_v21 }
 0x106   :  { %vm53_vm3 = vmor %vm51_vm2, %vm52_vm1 }
 0x107   :  { %v48_v23 = vsub.f32 1.0, %v47_v22 }
 0x109   :  { %v49_v25 = vmul.f32 %v99_v21, %v48_v23 }
 0x10b   :  { %v50_v27 = vadd.f32 %v99_v21, %v49_v25 }
 0x10d   :  { %v54_v29 = vsel %vm53_vm3, %v99_v21, %v50_v27 }
 0x10e   :  { %v59_v30 = vsel %vm56_vm4, %v58_v28, %v54_v29 }
 0x10f   :  { %v60_v31 = vmul.f32 %v59_v30, %v38_v14  ;;  %v61_v32 = vmul.f32 %v59_v30, %v39_v15 }
 0x111   :  { %v62_v33 = vadd.f32 0.5, %v60_v31  ;;  %v63_v34 = vadd.f32 0.5, %v61_v32 }
 0x113   :  { %v64_v35 = vmul.f32 0.5, %v62_v33  ;;  %v65_v36 = vmul.f32 0.5, %v63_v34 }
 0x115   :  { %100 = vtanh.f32 %v64_v35 }
 0x116   :  { %102 = vtanh.f32 %v65_v36 }
 0x11b   :  { %v101_v37 = vpop.eup %100 }
 0x11c   :  { %v103_v38 = vpop.eup %102  ;;  %v68_v39 = vadd.f32 1.0, %v101_v37 }
 0x11d   :  { %v69_v40 = vadd.f32 1.0, %v103_v38 }
 0x11e   :  { %v70_v41 = vmul.f32 0.5, %v68_v39 }
 0x11f   :  { %v71_v42 = vmul.f32 0.5, %v69_v40 }
 0x120   :  { %v72_v43 = vmul.f32 %v70_v41, %v23_v0 }
 0x121   :  { %v73_v44 = vmul.f32 %v71_v42, %v24_v1 }
 0x122   :  { %74 = vst [vmem:[#allocation5] sm:$0xff] %v72_v43 }
 0x123   :  { %75 = vst [vmem:[#allocation5 + $0x8] sm:$0xff] %v73_v44 }
 0x124   :  { %86 = dma.vmem_to_hbm [thread:$0]  %s82_s11, 256, %s84_s14, [#allocation4]  }
 0x125   :  { %154 = dma.done.wait [#allocation4], 256  }
 0x126   :  { %155 = vsyncadd [#allocation4], 4294967040 }
 0x127   :  { %91 = vsyncpa [#allocation3], 1 }
 0x128   :  { %92 = vsyncpa [#allocation4], 1 }

</bundles_post_ra>
